<compile_context>
chip_gen: v7x
topology: tpu7x:2x2x1
jax: 0.10.0
libtpu: 0.0.40
codegen_flags: <defaults>
</compile_context>

<pallas_src>
import jax
import jax.numpy as jnp
from jax.experimental import pallas as pl
from jax.experimental.pallas import tpu as pltpu


def dueling_kernel(x_ref, w1_ref, b1_ref, w2_ref, b2_ref, we_ref, be_ref, q_ref):
    # Trunk: two Linear+ReLU layers. bf16 operands -> MXU, f32 accumulation,
    # all elementwise work (bias add, ReLU) in f32.
    h1 = jnp.dot(x_ref[...], w1_ref[...], preferred_element_type=jnp.float32)
    h1 = jnp.maximum(h1 + b1_ref[...], 0.0)

    h2 = jnp.dot(h1.astype(w2_ref.dtype), w2_ref[...],
                 preferred_element_type=jnp.float32)
    h2 = jnp.maximum(h2 + b2_ref[...], 0.0)

    # Fused dueling head: value head, advantage head and the mean subtraction
    # are all folded into a single [128, AC_PAD] weight (done in the wrapper).
    q = jnp.dot(h2.astype(we_ref.dtype), we_ref[...],
                preferred_element_type=jnp.float32) + be_ref[...]
    q_ref[...] = q.astype(q_ref.dtype)


def dueling_forward(x, params):
    """DuelingNetwork forward pass as one Pallas kernel with a batch grid."""
    w1, b1, w2, b2, wv, bv, wa, ba = params
    B, obs = x.shape
    ac = wa.shape[1]

    # ---- algebraic head fusion (exact): q = h2 @ W_eff + b_eff -------------
    w_eff = wv + wa - jnp.mean(wa, axis=1, keepdims=True)      # [128, ac]
    b_eff = bv + ba - jnp.mean(ba, axis=1, keepdims=True)      # [1, ac]

    # ---- lane-dense output: pad ac up to a multiple of 128 -----------------
    ac_pad = ((ac + 127) // 128) * 128
    w_eff = jnp.pad(w_eff, ((0, 0), (0, ac_pad - ac)))
    b_eff = jnp.pad(b_eff, ((0, 0), (0, ac_pad - ac)))

    # ---- batch tiling -------------------------------------------------------
    TB = min(256, max(8, ((B + 7) // 8) * 8))   # multiple of 8, capped at 256
    n_tiles = pl.cdiv(B, TB)
    b_pad = n_tiles * TB
    if b_pad != B:
        x = jnp.pad(x, ((0, b_pad - B), (0, 0)))

    # ---- bf16 matmul operands (f32 accumulation in the kernel) -------------
    x_bf = x.astype(jnp.bfloat16)
    w1_bf = w1.astype(jnp.bfloat16)
    w2_bf = w2.astype(jnp.bfloat16)
    we_bf = w_eff.astype(jnp.bfloat16)

    # Weights / biases: full-array block, constant index_map -> VMEM-resident,
    # DMA'd once for the whole grid.
    const = lambda a: pl.BlockSpec(a.shape, lambda i: (0,) * a.ndim,
                                   memory_space=pltpu.VMEM)

    q_pad = pl.pallas_call(
        dueling_kernel,
        out_shape=jax.ShapeDtypeStruct((b_pad, ac_pad), jnp.float32),
        grid=(n_tiles,),
        in_specs=[
            pl.BlockSpec((TB, obs), lambda i: (i, 0), memory_space=pltpu.VMEM),
            const(w1_bf), const(b1),
            const(w2_bf), const(b2),
            const(we_bf), const(b_eff),
        ],
        out_specs=pl.BlockSpec((TB, ac_pad), lambda i: (i, 0),
                               memory_space=pltpu.VMEM),
        compiler_params=pltpu.CompilerParams(
            dimension_semantics=("parallel",)),   # 2 TCs on v7x
    )(x_bf, w1_bf, b1, w2_bf, b2, we_bf, b_eff)

    return q_pad[:B, :ac]


def init_params(key, obs, ac, hidden=128):
    """Deterministic init mimicking nn.Linear default (uniform +-1/sqrt(fan_in)).

    Weights are stored as (in, out) -- transposed relative to PyTorch.
    Biases are kept 2-D (1, out) so every ref in the kernel is >= 2-D.
    """
    ks = jax.random.split(key, 8)

    def lin(kw, kb, fan_in, fan_out):
        bound = 1.0 / jnp.sqrt(jnp.float32(fan_in))
        w = jax.random.uniform(kw, (fan_in, fan_out), jnp.float32, -bound, bound)
        b = jax.random.uniform(kb, (1, fan_out), jnp.float32, -bound, bound)
        return w, b

    w1, b1 = lin(ks[0], ks[1], obs, hidden)
    w2, b2 = lin(ks[2], ks[3], hidden, hidden)
    wv, bv = lin(ks[4], ks[5], hidden, 1)
    wa, ba = lin(ks[6], ks[7], hidden, ac)
    return (w1, b1, w2, b2, wv, bv, wa, ba)


def dueling_reference(x, params):
    """Pure-JAX f32 reference matching the PyTorch forward exactly."""
    w1, b1, w2, b2, wv, bv, wa, ba = params
    h = jnp.maximum(x @ w1 + b1, 0.0)
    h = jnp.maximum(h @ w2 + b2, 0.0)
    value = h @ wv + bv                       # [B, 1]
    adv = h @ wa + ba                         # [B, ac]
    return value + adv - adv.mean(axis=1, keepdims=True)


if __name__ == "__main__":
    B, OBS, AC = 8, 32, 6   # small shapes implied by the module (obs -> 128 -> 128 -> {1, ac})

    key = jax.random.PRNGKey(0)
    k_x, k_p = jax.random.split(key)
    x = jax.random.normal(k_x, (B, OBS), jnp.float32)
    params = init_params(k_p, OBS, AC)

    q = dueling_forward(x, params)
    q = jax.block_until_ready(q)

    q_ref = dueling_reference(x, params)
    assert q.shape == (B, AC)
    # bf16 matmul operands (f32 accumulate) vs. pure-f32 reference: values are
    # O(1), so a few e-3 absolute error is expected; 5e-2 is a safe bound.
    assert jnp.allclose(q, q_ref, atol=5e-2, rtol=5e-2), "mismatch vs reference"

    print("KERNEL_OK")
</pallas_src>

<mosaic_0001>
module attributes {stable_mosaic.version = 11 : i64} {
  func.func @dueling_kernel(%arg0: i32, %arg1: memref<8x32xbf16, #tpu.memory_space<vmem>>, %arg2: memref<32x128xbf16, #tpu.memory_space<vmem>>, %arg3: memref<1x128xf32, #tpu.memory_space<vmem>>, %arg4: memref<128x128xbf16, #tpu.memory_space<vmem>>, %arg5: memref<1x128xf32, #tpu.memory_space<vmem>>, %arg6: memref<128x128xbf16, #tpu.memory_space<vmem>>, %arg7: memref<1x128xf32, #tpu.memory_space<vmem>>, %arg8: memref<8x128xf32, #tpu.memory_space<vmem>>) attributes {dimension_semantics = [#tpu.dimension_semantics<parallel>], iteration_bounds = array<i64: 1>, scalar_prefetch = 0 : i64, scratch_operands = 0 : i64, tpu.core_type = #tpu.core_type<tc>, window_params = [{transform_indices = @transform_0, window_bounds = array<i64: 8, 32>}, {pipeline_mode = #tpu.pipeline_mode<synchronous>, transform_indices = @transform_1, window_bounds = array<i64: 32, 128>}, {pipeline_mode = #tpu.pipeline_mode<synchronous>, transform_indices = @transform_2, window_bounds = array<i64: 1, 128>}, {pipeline_mode = #tpu.pipeline_mode<synchronous>, transform_indices = @transform_3, window_bounds = array<i64: 128, 128>}, {pipeline_mode = #tpu.pipeline_mode<synchronous>, transform_indices = @transform_4, window_bounds = array<i64: 1, 128>}, {pipeline_mode = #tpu.pipeline_mode<synchronous>, transform_indices = @transform_5, window_bounds = array<i64: 128, 128>}, {pipeline_mode = #tpu.pipeline_mode<synchronous>, transform_indices = @transform_6, window_bounds = array<i64: 1, 128>}, {transform_indices = @transform_7, window_bounds = array<i64: 8, 128>}]} {
    %c0 = arith.constant 0 : index
    %c0_0 = arith.constant 0 : index
    %0 = vector.load %arg1[%c0, %c0_0] : memref<8x32xbf16, #tpu.memory_space<vmem>>, vector<8x32xbf16>
    %c0_1 = arith.constant 0 : index
    %c0_2 = arith.constant 0 : index
    %1 = vector.load %arg2[%c0_1, %c0_2] : memref<32x128xbf16, #tpu.memory_space<vmem>>, vector<32x128xbf16>
    %cst = arith.constant dense<0.000000e+00> : vector<8x128xf32>
    %2 = tpu.matmul %0, %1, %cst {dimension_numbers = #tpu.dot_dimension_numbers<[1], [0], [0], [1], [0, 0, 1, 1], [], []>} : vector<8x32xbf16>, vector<32x128xbf16>, vector<8x128xf32> -> vector<8x128xf32>
    %c0_3 = arith.constant 0 : index
    %c0_4 = arith.constant 0 : index
    %3 = vector.load %arg3[%c0_3, %c0_4] : memref<1x128xf32, #tpu.memory_space<vmem>>, vector<1x128xf32>
    %4 = vector.broadcast %3 : vector<1x128xf32> to vector<8x128xf32>
    %5 = arith.addf %2, %4 : vector<8x128xf32>
    %cst_5 = arith.constant 0.000000e+00 : f32
    %6 = vector.broadcast %cst_5 : f32 to vector<8x128xf32>
    %7 = arith.maximumf %5, %6 : vector<8x128xf32>
    %8 = arith.truncf %7 : vector<8x128xf32> to vector<8x128xbf16>
    %c0_6 = arith.constant 0 : index
    %c0_7 = arith.constant 0 : index
    %9 = vector.load %arg4[%c0_6, %c0_7] : memref<128x128xbf16, #tpu.memory_space<vmem>>, vector<128x128xbf16>
    %cst_8 = arith.constant dense<0.000000e+00> : vector<8x128xf32>
    %10 = tpu.matmul %8, %9, %cst_8 {dimension_numbers = #tpu.dot_dimension_numbers<[1], [0], [0], [1], [0, 0, 1, 1], [], []>} : vector<8x128xbf16>, vector<128x128xbf16>, vector<8x128xf32> -> vector<8x128xf32>
    %c0_9 = arith.constant 0 : index
    %c0_10 = arith.constant 0 : index
    %11 = vector.load %arg5[%c0_9, %c0_10] : memref<1x128xf32, #tpu.memory_space<vmem>>, vector<1x128xf32>
    %12 = vector.broadcast %11 : vector<1x128xf32> to vector<8x128xf32>
    %13 = arith.addf %10, %12 : vector<8x128xf32>
    %cst_11 = arith.constant 0.000000e+00 : f32
    %14 = vector.broadcast %cst_11 : f32 to vector<8x128xf32>
    %15 = arith.maximumf %13, %14 : vector<8x128xf32>
    %16 = arith.truncf %15 : vector<8x128xf32> to vector<8x128xbf16>
    %c0_12 = arith.constant 0 : index
    %c0_13 = arith.constant 0 : index
    %17 = vector.load %arg6[%c0_12, %c0_13] : memref<128x128xbf16, #tpu.memory_space<vmem>>, vector<128x128xbf16>
    %cst_14 = arith.constant dense<0.000000e+00> : vector<8x128xf32>
    %18 = tpu.matmul %16, %17, %cst_14 {dimension_numbers = #tpu.dot_dimension_numbers<[1], [0], [0], [1], [0, 0, 1, 1], [], []>} : vector<8x128xbf16>, vector<128x128xbf16>, vector<8x128xf32> -> vector<8x128xf32>
    %c0_15 = arith.constant 0 : index
    %c0_16 = arith.constant 0 : index
    %19 = vector.load %arg7[%c0_15, %c0_16] : memref<1x128xf32, #tpu.memory_space<vmem>>, vector<1x128xf32>
    %20 = vector.broadcast %19 : vector<1x128xf32> to vector<8x128xf32>
    %21 = arith.addf %18, %20 : vector<8x128xf32>
    %c0_17 = arith.constant 0 : index
    %c0_18 = arith.constant 0 : index
    %22 = vector.load %arg8[%c0_17, %c0_18] : memref<8x128xf32, #tpu.memory_space<vmem>>, vector<8x128xf32>
    tpu.vector_store %arg8[%c0_17, %c0_18], %21 {strides = array<i32>} : memref<8x128xf32, #tpu.memory_space<vmem>>, vector<8x128xf32>,
    return
  }
  func.func @transform_0(%arg0: i32) -> (i32, i32) {
    %c0_i32 = arith.constant 0 : i32
    %c0_i32_0 = arith.constant 0 : i32
    return %arg0, %c0_i32 : i32, i32
  }
  func.func @transform_1(%arg0: i32) -> (i32, i32) {
    %c0_i32 = arith.constant 0 : i32
    %c0_i32_0 = arith.constant 0 : i32
    %c0_i32_1 = arith.constant 0 : i32
    return %c0_i32, %c0_i32_0 : i32, i32
  }
  func.func @transform_2(%arg0: i32) -> (i32, i32) {
    %c0_i32 = arith.constant 0 : i32
    %c0_i32_0 = arith.constant 0 : i32
    %c0_i32_1 = arith.constant 0 : i32
    return %c0_i32, %c0_i32_0 : i32, i32
  }
  func.func @transform_3(%arg0: i32) -> (i32, i32) {
    %c0_i32 = arith.constant 0 : i32
    %c0_i32_0 = arith.constant 0 : i32
    %c0_i32_1 = arith.constant 0 : i32
    return %c0_i32, %c0_i32_0 : i32, i32
  }
  func.func @transform_4(%arg0: i32) -> (i32, i32) {
    %c0_i32 = arith.constant 0 : i32
    %c0_i32_0 = arith.constant 0 : i32
    %c0_i32_1 = arith.constant 0 : i32
    return %c0_i32, %c0_i32_0 : i32, i32
  }
  func.func @transform_5(%arg0: i32) -> (i32, i32) {
    %c0_i32 = arith.constant 0 : i32
    %c0_i32_0 = arith.constant 0 : i32
    %c0_i32_1 = arith.constant 0 : i32
    return %c0_i32, %c0_i32_0 : i32, i32
  }
  func.func @transform_6(%arg0: i32) -> (i32, i32) {
    %c0_i32 = arith.constant 0 : i32
    %c0_i32_0 = arith.constant 0 : i32
    %c0_i32_1 = arith.constant 0 : i32
    return %c0_i32, %c0_i32_0 : i32, i32
  }
  func.func @transform_7(%arg0: i32) -> (i32, i32) {
    %c0_i32 = arith.constant 0 : i32
    %c0_i32_0 = arith.constant 0 : i32
    return %arg0, %c0_i32 : i32, i32
  }
}

</mosaic_0001>

<bundles_post_ra>
// kernel: tpu_custom_call.1
= control target key start
LH: loop header
LB: loop body
LE: loop exit
PB: predicated region body
PF: predicated region fallthrough
CT: control target
= control target key end

     0   :  { %12 = vsyncpa [#allocation3], 0  ;;  %s780_s0 = inlined_call_operand.hbm [shape: bf16[8,32], index: 0, kind: input, shape index: {}]   ;;  %s781_s1 = inlined_call_operand.hbm [shape: bf16[32,128], index: 1, kind: input, shape index: {}]   ;;  %s782_s2 = inlined_call_operand.vmem [shape: f32[1,128], index: 2, kind: input, shape index: {}]   ;;  %s783_s3 = inlined_call_operand.hbm [shape: bf16[128,128], index: 3, kind: input, shape index: {}]   ;;  %s784_s4 = inlined_call_operand.vmem [shape: f32[1,128], index: 4, kind: input, shape index: {}]   ;;  %s785_s5 = inlined_call_operand.hbm [shape: bf16[128,128], index: 5, kind: input, shape index: {}]   ;;  %s786_s6 = inlined_call_operand.vmem [shape: f32[1,128], index: 6, kind: input, shape index: {}]   ;;  %s787_s7 = inlined_call_operand.hbm [shape: f32[8,128], index: 7, kind: output, shape index: {}]  }
   0x1   :  { %13 = vsyncpa [#allocation6], 0 }
   0x2   :  { %14 = vsyncpa [#allocation9], 0 }
   0x3   :  { %15 = vsyncpa [#allocation4], 0  ;;  %s629_s24 = smov [#allocation5]   ;;  %s511_s28 = scalar_lea.hbm %s781_s1, 256 }
   0x4   :  { %s31_s25 = sshll.u32 %s629_s24, 4  ;;  %p512_p0 = scmp.ne.s32.totalorder %s781_s1, %s511_s28  ;;  %s32_s25 = int_to_ptr.vmem [resolvable:$true] %s31_s25 }
   0x5   :  { %p515_p1 = scmp.lt.u32.totalorder %s511_s28, %s781_s1 }
   0x7   :  { %p517_p2 = pnand %p515_p1, %p512_p0 }
   0x9   :  { %520 = shalt.err (!%p517_p2)
}
   0xa   :  { %s521_s10 = scalar_lea.vmem %s32_s25, 256  ;;  %p526_p4 = scmp.lt.s32.totalorder %s32_s25, %s32_s25 }
   0xb   :  { %p522_p3 = scmp.ne.s32.totalorder %s32_s25, %s521_s10  ;;  %p527_p5 = scmp.lt.s32.totalorder %s521_s10, %s521_s10 }
   0xd   :  { %p528_p6 = por %p527_p5, %p526_p4 }
   0xf   :  { %p529_p7 = pnand %p528_p6, %p522_p3 }
  0x11   :  { %532 = shalt.err (!%p529_p7)
}
  0x12   :  { %s630_s11 = smov 64   ;;  %s631_s12 = smov 4  }
  0x13   :  { %37 = dma.hbm_to_vmem [thread:$0]  %s781_s1, 256, %s32_s25, [#allocation6], %s630_s11, %s630_s11, %s631_s12  }
  0x14   :  { %s632_s15 = smov [#allocation2]   ;;  %s633_s17 = smov [#allocation7]  }
  0x15   :  { %s22_s16 = sshll.u32 %s632_s15, 4  ;;  %s45_s18 = sshll.u32 %s633_s17, 4  ;;  %s23_s16 = int_to_ptr.vmem [resolvable:$true] %s22_s16  ;;  %s46_s18 = int_to_ptr.vmem [resolvable:$true] %s45_s18 }
  0x16   :  { %s533_s21 = scalar_lea.hbm %s780_s0, 64 }
  0x17   :  { %p534_p8 = scmp.ne.s32.totalorder %s780_s0, %s533_s21  ;;  %p537_p9 = scmp.lt.u32.totalorder %s533_s21, %s780_s0 }
  0x19   :  { %p539_p10 = pnand %p537_p9, %p534_p8 }
  0x1b   :  { %542 = shalt.err (!%p539_p10)
}
  0x1c   :  { %s543_s1 = scalar_lea.vmem %s23_s16, 64  ;;  %p548_p12 = scmp.lt.s32.totalorder %s23_s16, %s23_s16 }
  0x1d   :  { %p544_p11 = scmp.ne.s32.totalorder %s23_s16, %s543_s1  ;;  %p549_p13 = scmp.lt.s32.totalorder %s543_s1, %s543_s1 }
  0x1f   :  { %p550_p0 = por %p549_p13, %p548_p12 }
  0x21   :  { %p551_p1 = pnand %p550_p0, %p544_p11 }
  0x23   :  { %554 = shalt.err (!%p551_p1)
}
  0x24   :  { %25 = dma.hbm_to_vmem [thread:$0]  %s780_s0, 64, %s23_s16, [#allocation3]  }
  0x25   :  { %s555_s30 = scalar_lea.hbm %s783_s3, 1024 }
  0x26   :  { %p556_p2 = scmp.ne.s32.totalorder %s783_s3, %s555_s30  ;;  %p559_p3 = scmp.lt.u32.totalorder %s555_s30, %s783_s3 }
  0x28   :  { %p561_p4 = pnand %p559_p3, %p556_p2 }
  0x2a   :  { %564 = shalt.err (!%p561_p4)
}
  0x2b   :  { %s565_s14 = scalar_lea.vmem %s46_s18, 1024  ;;  %p570_p6 = scmp.lt.s32.totalorder %s46_s18, %s46_s18 }
  0x2c   :  { %p566_p5 = scmp.ne.s32.totalorder %s46_s18, %s565_s14  ;;  %p571_p7 = scmp.lt.s32.totalorder %s565_s14, %s565_s14 }
  0x2e   :  { %p572_p8 = por %p571_p7, %p570_p6 }
  0x30   :  { %p573_p9 = pnand %p572_p8, %p566_p5 }
  0x32   :  { %576 = shalt.err (!%p573_p9)
}
  0x33   :  { %51 = dma.hbm_to_vmem [thread:$0]  %s783_s3, 1024, %s46_s18, [#allocation6], %s630_s11, %s630_s11, %s631_s12  }
  0x34   :  { %s634_s16 = smov [#allocation8]   ;;  %s577_s21 = scalar_lea.hbm %s785_s5, 1024 }
  0x35   :  { %s59_s17 = sshll.u32 %s634_s16, 4  ;;  %p578_p10 = scmp.ne.s32.totalorder %s785_s5, %s577_s21  ;;  %s60_s17 = int_to_ptr.vmem [resolvable:$true] %s59_s17 }
  0x36   :  { %p581_p11 = scmp.lt.u32.totalorder %s577_s21, %s785_s5 }
  0x38   :  { %p583_p12 = pnand %p581_p11, %p578_p10 }
  0x3a   :  { %586 = shalt.err (!%p583_p12)
}
  0x3b   :  { %s587_s1 = scalar_lea.vmem %s60_s17, 1024  ;;  %p592_p0 = scmp.lt.s32.totalorder %s60_s17, %s60_s17 }
  0x3c   :  { %p588_p13 = scmp.ne.s32.totalorder %s60_s17, %s587_s1  ;;  %p593_p1 = scmp.lt.s32.totalorder %s587_s1, %s587_s1 }
  0x3e   :  { %p594_p2 = por %p593_p1, %p592_p0 }
  0x40   :  { %p595_p3 = pnand %p594_p2, %p588_p13 }
  0x42   :  { %598 = shalt.err (!%p595_p3)
}
  0x43   :  { %65 = dma.hbm_to_vmem [thread:$0]  %s785_s5, 1024, %s60_s17, [#allocation9], %s630_s11, %s630_s11, %s631_s12  }
  0x44   :  { %621 = dma.done.wait [#allocation3], 64  }
  0x45   :  { %622 = vsyncadd [#allocation3], 4294967232 }
  0x46   :  { %623 = dma.done.wait [#allocation6], 1280  }
  0x47   :  { %624 = vsyncadd [#allocation6], 4294966016 }
  0x48   :  { %625 = dma.done.wait [#allocation9], 1024  }
  0x49   :  { %626 = vsyncadd [#allocation9], 4294966272  ;;  %v635_v0 = vmov 0.0   ;;  %vm636_vm0 = vmmov 0   ;;  %v493_v1 = vld [vmem:[#allocation5] sm:$0xff]   ;;  %v494_v2 = vld [vmem:[#allocation5 + $0x8] sm:$0xff]  }
  0x4a   :  { %436 = vmatprep.subr.bf16.mxu0 %v635_v0  ;;  %440 = vmatprep.mubr.msk.bf16.mxu0 %vm636_vm0, %v635_v0  ;;  %v495_v3 = vld [vmem:[#allocation7] sm:$0xff]   ;;  %vm105_vm1 = vcmask 261120   ;;  %v496_v4 = vld [vmem:[#allocation7 + $0x8] sm:$0xff]   ;;  %v497_v6 = vld [vmem:[#allocation7 + $0x10] sm:$0xff]   ;;  %s637_s28 = smov [#allocation10]  }
  0x4b   :  { %444 = vmatprep.subr.bf16.mxu1 %v635_v0  ;;  %460 = vmatprep.mubr.msk.bf16.mxu1 %vm636_vm0, %v635_v0  ;;  %v81_v5 = vld [vmem:[#allocation2] sm:$0xf]  ;;  %v498_v7 = vld [vmem:[#allocation7 + $0x18] sm:$0xff]   ;;  %v499_v8 = vld [vmem:[#allocation7 + $0x20] sm:$0xff]   ;;  %s382_s29 = sshll.u32 %s637_s28, 4  ;;  %s383_s29 = int_to_ptr.vmem [resolvable:$true] %s382_s29 }
  0x4c   :  { %437 = vmatpush3.bf16.msra.mxu0 %v493_v1  ;;  %445 = vmatpush3.bf16.msra.mxu1 %v495_v3  ;;  %v500_v9 = vld [vmem:[#allocation7 + $0x28] sm:$0xff]   ;;  %v501_v10 = vld [vmem:[#allocation7 + $0x30] sm:$0xff]   ;;  %v502_v11 = vld [vmem:[#allocation7 + $0x38] sm:$0xff]   ;;  %p604_p5 = scmp.lt.s32.totalorder %s383_s29, %s383_s29 }
  0x4d   :  { %438 = vmatprep.subr.bf16.mxu0 %v635_v0  ;;  %446 = vmatprep.subr.bf16.mxu1 %v635_v0  ;;  %v503_v12 = vld [vmem:[#allocation8] sm:$0xff]   ;;  %v504_v13 = vld [vmem:[#allocation8 + $0x8] sm:$0xff]   ;;  %v505_v14 = vld [vmem:[#allocation8 + $0x10] sm:$0xff]  }
  0x4e   :  { %v506_v15 = vld [vmem:[#allocation8 + $0x18] sm:$0xff]   ;;  %v507_v16 = vld [vmem:[#allocation8 + $0x20] sm:$0xff]   ;;  %v508_v17 = vld [vmem:[#allocation8 + $0x28] sm:$0xff]  }
  0x4f   :  { %v393_v18 = vld [vmem:[%s782_s2] ss:$0 sm:$0xff]  ;;  %v509_v26 = vld [vmem:[#allocation8 + $0x30] sm:$0xff]   ;;  %v510_v27 = vld [vmem:[#allocation8 + $0x38] sm:$0xff]  }
  0x50   :  { %439 = vmatpush3.bf16.msra.mxu0 %v494_v2  ;;  %447 = vmatpush3.bf16.msra.mxu1 %v496_v4  ;;  %v397_v28 = vld [vmem:[%s784_s4] ss:$0 sm:$0xff]  ;;  %s599_s4 = scalar_lea.vmem %s383_s29, 128 }
  0x51   :  { %464 = vmatprep.subr.bf16.mxu0 %v635_v0  ;;  %448 = vmatprep.subr.bf16.mxu1 %v635_v0  ;;  %v406_v36 = vld [vmem:[%s786_s6] ss:$0 sm:$0xff]  ;;  %p600_p4 = scmp.ne.s32.totalorder %s383_s29, %s599_s4  ;;  %p605_p6 = scmp.lt.s32.totalorder %s599_s4, %s599_s4 }
  0x53   :  { %441 = vmatmul.mubr.msk.bf16.vlgmr.msra.gmra.mrb[0].mxu0 %vm105_vm1, %v81_v5  ;;  %p606_p7 = por %p605_p6, %p604_p5 }
  0x54   :  { %480 = vmatprep.mubr.msk.bf16.mxu0 %vm636_vm0, %v635_v0  ;;  %449 = vmatpush3.bf16.msra.mxu1 %v497_v6 }
  0x55   :  { %450 = vmatprep.subr.bf16.mxu1 %v635_v0  ;;  %465 = vmatpush3.bf16.msra.mxu0 %v503_v12  ;;  %p607_p8 = pnand %p606_p7, %p600_p4 }
  0x56   :  { %466 = vmatprep.subr.bf16.mxu0 %v635_v0 }
  0x58   :  { %451 = vmatpush3.bf16.msra.mxu1 %v498_v7 }
  0x59   :  { %452 = vmatprep.subr.bf16.mxu1 %v635_v0  ;;  %467 = vmatpush3.bf16.msra.mxu0 %v504_v13 }
  0x5a   :  { %468 = vmatprep.subr.bf16.mxu0 %v635_v0 }
  0x5c   :  { %453 = vmatpush3.bf16.msra.mxu1 %v499_v8 }
  0x5d   :  { %454 = vmatprep.subr.bf16.mxu1 %v635_v0  ;;  %469 = vmatpush3.bf16.msra.mxu0 %v505_v14 }
  0x5e   :  { %470 = vmatprep.subr.bf16.mxu0 %v635_v0 }
  0x60   :  { %455 = vmatpush3.bf16.msra.mxu1 %v500_v9 }
  0x61   :  { %456 = vmatprep.subr.bf16.mxu1 %v635_v0  ;;  %471 = vmatpush3.bf16.msra.mxu0 %v506_v15 }
  0x62   :  { %472 = vmatprep.subr.bf16.mxu0 %v635_v0 }
  0x64   :  { %457 = vmatpush3.bf16.msra.mxu1 %v501_v10 }
  0x65   :  { %458 = vmatprep.subr.bf16.mxu1 %v635_v0  ;;  %473 = vmatpush3.bf16.msra.mxu0 %v507_v16 }
  0x66   :  { %474 = vmatprep.subr.bf16.mxu0 %v635_v0 }
  0x68   :  { %459 = vmatpush3.bf16.msra.mxu1 %v502_v11 }
  0x69   :  { %475 = vmatpush3.bf16.msra.mxu0 %v508_v17 }
  0x6a   :  { %476 = vmatprep.subr.bf16.mxu0 %v635_v0 }
  0x6d   :  { %477 = vmatpush3.bf16.msra.mxu0 %v509_v26 }
  0x6e   :  { %478 = vmatprep.subr.bf16.mxu0 %v635_v0 }
  0x71   :  { %479 = vmatpush3.bf16.msra.mxu0 %v510_v27 }
 0x126   :  { %v143_v19 = vpop.f32.mrb[0].mxu0 }
 0x127   :  { %v144_v20 = vadd.f32 %v393_v18, %v143_v19  ;;  %v442_v21 = vpop.f32.mrb[1].mxu0 }
 0x128   :  { %v146_v22 = vpop.f32.mrb[2].mxu0 }
 0x129   :  { %v149_v23 = vmax.f32 %v144_v20, 0.0  ;;  %v443_v24 = vpop.f32.mrb[3].mxu0 }
 0x12b   :  { %v150_v25 = vpack.c.bf16 %v149_v23, %v149_v23 }
 0x12d   :  { %461 = vmatmul.mubr.bf16.vlgmr.msra.gmra.mrb[0].mxu1 %v150_v25 }
 0x200   :  { %v256_v29 = vpop.f32.mrb[0].mxu1 }
 0x201   :  { %v257_v30 = vadd.f32 %v397_v28, %v256_v29  ;;  %v462_v31 = vpop.f32.mrb[1].mxu1 }
 0x202   :  { %v259_v32 = vpop.f32.mrb[2].mxu1 }
 0x203   :  { %v262_v33 = vmax.f32 %v257_v30, 0.0  ;;  %v463_v34 = vpop.f32.mrb[3].mxu1 }
 0x205   :  { %v263_v35 = vpack.c.bf16 %v262_v33, %v262_v33 }
 0x207   :  { %481 = vmatmul.mubr.bf16.vlgmr.msra.gmra.mrb[4].mxu0 %v263_v35 }
 0x2da   :  { %v369_v37 = vpop.f32.mrb[4].mxu0 }
 0x2db   :  { %v370_v38 = vadd.f32 %v406_v36, %v369_v37  ;;  %v482_v39 = vpop.f32.mrb[5].mxu0 }
 0x2dc   :  { %v372_v40 = vpop.f32.mrb[6].mxu0 }
 0x2dd   :  { %375 = vst [vmem:[#allocation10] sm:$0xff] %v370_v38  ;;  %v483_v41 = vpop.f32.mrb[7].mxu0 }
 0x2de   :  { %610 = shalt.err (!%p607_p8)
}
 0x2df   :  { %s611_s6 = scalar_lea.hbm %s787_s7, 128 }
 0x2e0   :  { %p612_p9 = scmp.ne.s32.totalorder %s787_s7, %s611_s6  ;;  %p615_p10 = scmp.lt.u32.totalorder %s611_s6, %s787_s7 }
 0x2e2   :  { %p617_p11 = pnand %p615_p10, %p612_p9 }
 0x2e4   :  { %620 = shalt.err (!%p617_p11)
}
 0x2e5   :  { %385 = dma.vmem_to_hbm [thread:$0]  %s383_s29, 128, %s787_s7, [#allocation4]  }
 0x2e6   :  { %627 = dma.done.wait [#allocation4], 128  }
 0x2e7   :  { %628 = vsyncadd [#allocation4], 4294967168 }
 0x2e8   :  { %389 = vsyncpa [#allocation3], 1 }
 0x2e9   :  { %390 = vsyncpa [#allocation6], 1 }
 0x2ea   :  { %391 = vsyncpa [#allocation9], 1 }
 0x2eb   :  { %392 = vsyncpa [#allocation4], 1 }

</bundles_post_ra>
